<compile_context>
chip_gen: v6e
topology: v6e:2x2x1
jax: 0.10.0
libtpu: 0.0.40
codegen_flags: <defaults>
</compile_context>

<pallas_src>
import jax
import jax.numpy as jnp
from jax.experimental import pallas as pl
from jax.experimental.pallas import tpu as pltpu


def _patch_embed_kernel(x_ref, w_ref, b_ref, o_ref):
    # x_ref: (tm, CKp) bf16/f32   w_ref: (CKp, Np) bf16/f32
    # b_ref: (1, Np)   f32        o_ref: (tm, Np)  out_dtype
    acc = jnp.dot(x_ref[...], w_ref[...], preferred_element_type=jnp.float32)
    o_ref[...] = (acc + b_ref[...]).astype(o_ref.dtype)


def _round_up(x, m):
    return ((x + m - 1) // m) * m


def _tpu_vmem_capacity_bytes():
    """Physical VMEM per TensorCore; conservative (v7x-sized) fallback."""
    try:
        info = pltpu.get_tpu_info()
        cap = getattr(info, "vmem_capacity_bytes", None)
        if cap:
            return int(cap)
    except Exception:
        pass
    return 64 << 20


def _choose_tile_m(M, CKp, Np, act_bytes, out_bytes, *, vmem_budget,
                   two_tensorcores):
    """MXU-matched M tile (multiple of 16 for bf16 sublane packing), capped so
    the per-step working set fits the generation-aware VMEM budget."""
    # Resident (single-buffered) weight + bias; double-buffered act-in / out.
    weight_resident = CKp * Np * act_bytes + Np * 4
    per_row = 2 * (CKp * act_bytes + Np * out_bytes)
    cap = (vmem_budget - weight_resident) // max(per_row, 1)
    cap = max(16, (cap // 16) * 16)

    if M <= 256:
        if two_tensorcores and M >= 64:
            # Keep >= 2 grid steps so the "parallel" axis shards across
            # v7x's two TensorCores.
            tm = _round_up(pl.cdiv(M, 2), 16)
        else:
            # Single-TC chips: one step; per-step overhead (~0.35us) dwarfs
            # a tiny matmul, so splitting buys nothing.
            tm = _round_up(M, 16)
    elif M >= 1024 and not two_tensorcores:
        tm = 512          # v5e/v6e: ~85% of HBM roofline at 512-wide tiles
    else:
        tm = 256          # matches the 256x256 MXU row dim; v7x-safe
    return int(min(tm, cap))


def patch_embed(x, weight, bias, k, s, *, use_bf16=True, out_dtype=None):
    """Equivalent of nn.Conv1d(c1, c2, k, s)(x).transpose(1, 2).

    x:      (B, C1, L)
    weight: (C2, C1, k)  (PyTorch Conv1d weight layout)
    bias:   (C2,)
    returns (B, L_out, C2) in out_dtype (defaults to x.dtype; pass
    jnp.bfloat16 to halve output HBM traffic when the consumer is bf16).
    """
    assert k == s, "PatchEmbed kernel assumes stride == kernel_size"
    B, C1, L = x.shape
    C2 = weight.shape[0]
    L_out = (L - k) // s + 1
    CK = C1 * k
    M = B * L_out

    out_dtype = x.dtype if out_dtype is None else out_dtype
    compute_dtype = jnp.bfloat16 if use_bf16 else x.dtype
    act_bytes = jnp.dtype(compute_dtype).itemsize
    out_bytes = jnp.dtype(out_dtype).itemsize

    # --- generation-aware VMEM budget / scoped limit ---
    vmem_cap = _tpu_vmem_capacity_bytes()
    two_tensorcores = vmem_cap <= (96 << 20)   # 64 MiB VMEM => v7x (2 TCs)
    if two_tensorcores:
        vmem_budget, vmem_limit = 24 << 20, 32 << 20
    else:
        vmem_budget, vmem_limit = 48 << 20, 64 << 20

    # --- lane-dense K and N (zero padding is exact for the dot) ---
    Np = _round_up(C2, 128)
    CKp = _round_up(CK, 128)

    tm = _choose_tile_m(M, CKp, Np, act_bytes, out_bytes,
                        vmem_budget=vmem_budget,
                        two_tensorcores=two_tensorcores)
    M_pad = _round_up(M, tm)

    # --- patch rearrange (one transpose pass; the pad/cast fuse into it and
    # allow_input_fusion lets XLA pull the producer chain into the input DMA).
    x_c = x[:, :, : L_out * s]                                  # (B, C1, L_out*k)
    patches = jnp.transpose(x_c.reshape(B, C1, L_out, k), (0, 2, 1, 3))
    patches = patches.reshape(M, CK).astype(compute_dtype)
    if M_pad != M or CKp != CK:
        patches = jnp.pad(patches, ((0, M_pad - M), (0, CKp - CK)))

    w2 = weight.reshape(C2, CK).T.astype(compute_dtype)         # (CK, C2)
    b2 = bias.reshape(1, C2).astype(jnp.float32)
    if CKp != CK or Np != C2:
        w2 = jnp.pad(w2, ((0, CKp - CK), (0, Np - C2)))
        b2 = jnp.pad(b2, ((0, 0), (0, Np - C2)))

    grid = (M_pad // tm,)
    cost = pl.CostEstimate(
        flops=2 * M_pad * CKp * Np,
        transcendentals=0,
        bytes_accessed=(M_pad * CKp * act_bytes + CKp * Np * act_bytes
                        + Np * 4 + M_pad * Np * out_bytes),
    )

    # Single-buffer the resident weight/bias blocks only when they are big
    # enough to matter (their index_map is constant -> never re-streamed).
    single_buffer_weights = CKp * Np * act_bytes > (2 << 20)

    def _call(use_single_buffer, use_input_fusion):
        wb_kwargs = ({"pipeline_mode": pl.Buffered(1)}
                     if use_single_buffer else {})
        in_specs = [
            pl.BlockSpec((tm, CKp), lambda m: (m, 0)),
            pl.BlockSpec((CKp, Np), lambda m: (0, 0), **wb_kwargs),
            pl.BlockSpec((1, Np), lambda m: (0, 0), **wb_kwargs),
        ]
        compiler_params = pltpu.CompilerParams(
            dimension_semantics=("parallel",),
            vmem_limit_bytes=vmem_limit,
            allow_input_fusion=([True, False, False]
                                if use_input_fusion else None),
        )
        return pl.pallas_call(
            _patch_embed_kernel,
            out_shape=jax.ShapeDtypeStruct((M_pad, Np), out_dtype),
            grid_spec=pltpu.PrefetchScalarGridSpec(
                num_scalar_prefetch=0,
                grid=grid,
                in_specs=in_specs,
                out_specs=pl.BlockSpec((tm, Np), lambda m: (m, 0)),
            ),
            compiler_params=compiler_params,
            cost_estimate=cost,
        )(patches, w2, b2)

    try:
        out = _call(single_buffer_weights, True)
    except Exception:
        # Fallback: plain double-buffered specs, no input-fusion hint.
        out = _call(False, False)

    return out[:M, :C2].reshape(B, L_out, C2)


if __name__ == "__main__":
    # Small shapes consistent with the module's forward:
    #   Conv1d(c1=32, c2=64, k=8, s=8) applied to x of shape (B=2, 32, 64)
    B, C1, L = 2, 32, 64
    C2, K, S = 64, 8, 8

    key = jax.random.PRNGKey(0)
    kx, kw, kb = jax.random.split(key, 3)
    x = jax.random.normal(kx, (B, C1, L), dtype=jnp.float32)
    weight = jax.random.normal(kw, (C2, C1, K), dtype=jnp.float32) * 0.05
    bias = jax.random.normal(kb, (C2,), dtype=jnp.float32) * 0.05

    out = patch_embed(x, weight, bias, K, S)
    out = jax.block_until_ready(out)

    # Reference: conv1d (NCL layout) then transpose(1, 2), computed in fp32.
    ref = jax.lax.conv_general_dilated(
        x, weight, window_strides=(S,), padding="VALID",
        dimension_numbers=("NCH", "OIH", "NCH"))
    ref = jnp.transpose(ref + bias[None, :, None], (0, 2, 1))

    assert out.shape == (B, (L - K) // S + 1, C2)
    # bf16 matmul inputs (fp32 accumulation) -> loosened tolerance vs fp32 ref.
    assert jnp.allclose(out, ref, atol=3e-2, rtol=3e-2), (
        float(jnp.max(jnp.abs(out - ref))))

    print("KERNEL_OK")
</pallas_src>

<mosaic_0001>
module attributes {stable_mosaic.version = 11 : i64} {
  func.func @_patch_embed_kernel(%arg0: i32, %arg1: memref<16x256xbf16, #tpu.memory_space<vmem>>, %arg2: memref<256x128xbf16, #tpu.memory_space<vmem>>, %arg3: memref<1x128xf32, #tpu.memory_space<vmem>>, %arg4: memref<16x128xf32, #tpu.memory_space<vmem>>) attributes {dimension_semantics = [#tpu.dimension_semantics<parallel>], iteration_bounds = array<i64: 1>, scalar_prefetch = 0 : i64, scratch_operands = 0 : i64, tpu.core_type = #tpu.core_type<tc>, window_params = [{transform_indices = @transform_0, window_bounds = array<i64: 16, 256>}, {pipeline_mode = #tpu.pipeline_mode<synchronous>, transform_indices = @transform_1, window_bounds = array<i64: 256, 128>}, {pipeline_mode = #tpu.pipeline_mode<synchronous>, transform_indices = @transform_2, window_bounds = array<i64: 1, 128>}, {transform_indices = @transform_3, window_bounds = array<i64: 16, 128>}]} {
    %c0 = arith.constant 0 : index
    %c0_0 = arith.constant 0 : index
    %0 = vector.load %arg1[%c0, %c0_0] : memref<16x256xbf16, #tpu.memory_space<vmem>>, vector<16x256xbf16>
    %c0_1 = arith.constant 0 : index
    %c0_2 = arith.constant 0 : index
    %1 = vector.load %arg2[%c0_1, %c0_2] : memref<256x128xbf16, #tpu.memory_space<vmem>>, vector<256x128xbf16>
    %cst = arith.constant dense<0.000000e+00> : vector<16x128xf32>
    %2 = tpu.matmul %0, %1, %cst {dimension_numbers = #tpu.dot_dimension_numbers<[1], [0], [0], [1], [0, 0, 1, 1], [], []>} : vector<16x256xbf16>, vector<256x128xbf16>, vector<16x128xf32> -> vector<16x128xf32>
    %c0_3 = arith.constant 0 : index
    %c0_4 = arith.constant 0 : index
    %3 = vector.load %arg3[%c0_3, %c0_4] : memref<1x128xf32, #tpu.memory_space<vmem>>, vector<1x128xf32>
    %4 = vector.broadcast %3 : vector<1x128xf32> to vector<16x128xf32>
    %5 = arith.addf %2, %4 : vector<16x128xf32>
    %c0_5 = arith.constant 0 : index
    %c0_6 = arith.constant 0 : index
    %6 = vector.load %arg4[%c0_5, %c0_6] : memref<16x128xf32, #tpu.memory_space<vmem>>, vector<16x128xf32>
    tpu.vector_store %arg4[%c0_5, %c0_6], %5 {strides = array<i32>} : memref<16x128xf32, #tpu.memory_space<vmem>>, vector<16x128xf32>,
    return
  }
  func.func @transform_0(%arg0: i32) -> (i32, i32) {
    %c0_i32 = arith.constant 0 : i32
    %c0_i32_0 = arith.constant 0 : i32
    return %arg0, %c0_i32 : i32, i32
  }
  func.func @transform_1(%arg0: i32) -> (i32, i32) {
    %c0_i32 = arith.constant 0 : i32
    %c0_i32_0 = arith.constant 0 : i32
    %c0_i32_1 = arith.constant 0 : i32
    return %c0_i32, %c0_i32_0 : i32, i32
  }
  func.func @transform_2(%arg0: i32) -> (i32, i32) {
    %c0_i32 = arith.constant 0 : i32
    %c0_i32_0 = arith.constant 0 : i32
    %c0_i32_1 = arith.constant 0 : i32
    return %c0_i32, %c0_i32_0 : i32, i32
  }
  func.func @transform_3(%arg0: i32) -> (i32, i32) {
    %c0_i32 = arith.constant 0 : i32
    %c0_i32_0 = arith.constant 0 : i32
    return %arg0, %c0_i32 : i32, i32
  }
}

module attributes {stable_mosaic.version = 11 : i64} {
  func.func @_patch_embed_kernel(%arg0: i32, %arg1: memref<16x256xbf16, #tpu.memory_space<vmem>>, %arg2: memref<256x128xbf16, #tpu.memory_space<vmem>>, %arg3: memref<1x128xf32, #tpu.memory_space<vmem>>, %arg4: memref<16x128xf32, #tpu.memory_space<vmem>>) attributes {dimension_semantics = [#tpu.dimension_semantics<parallel>], iteration_bounds = array<i64: 1>, scalar_prefetch = 0 : i64, scratch_operands = 0 : i64, tpu.core_type = #tpu.core_type<tc>, window_params = [{transform_indices = @transform_0, window_bounds = array<i64: 16, 256>}, {pipeline_mode = #tpu.pipeline_mode<synchronous>, transform_indices = @transform_1, window_bounds = array<i64: 256, 128>}, {pipeline_mode = #tpu.pipeline_mode<synchronous>, transform_indices = @transform_2, window_bounds = array<i64: 1, 128>}, {transform_indices = @transform_3, window_bounds = array<i64: 16, 128>}]} {
    %c0 = arith.constant 0 : index
    %c0_0 = arith.constant 0 : index
    %0 = vector.load %arg1[%c0, %c0_0] : memref<16x256xbf16, #tpu.memory_space<vmem>>, vector<16x256xbf16>
    %c0_1 = arith.constant 0 : index
    %c0_2 = arith.constant 0 : index
    %1 = vector.load %arg2[%c0_1, %c0_2] : memref<256x128xbf16, #tpu.memory_space<vmem>>, vector<256x128xbf16>
    %cst = arith.constant dense<0.000000e+00> : vector<16x128xf32>
    %2 = tpu.matmul %0, %1, %cst {dimension_numbers = #tpu.dot_dimension_numbers<[1], [0], [0], [1], [0, 0, 1, 1], [], []>} : vector<16x256xbf16>, vector<256x128xbf16>, vector<16x128xf32> -> vector<16x128xf32>
    %c0_3 = arith.constant 0 : index
    %c0_4 = arith.constant 0 : index
    %3 = vector.load %arg3[%c0_3, %c0_4] : memref<1x128xf32, #tpu.memory_space<vmem>>, vector<1x128xf32>
    %4 = vector.broadcast %3 : vector<1x128xf32> to vector<16x128xf32>
    %5 = arith.addf %2, %4 : vector<16x128xf32>
    %c0_5 = arith.constant 0 : index
    %c0_6 = arith.constant 0 : index
    %6 = vector.load %arg4[%c0_5, %c0_6] : memref<16x128xf32, #tpu.memory_space<vmem>>, vector<16x128xf32>
    tpu.vector_store %arg4[%c0_5, %c0_6], %5 {strides = array<i32>} : memref<16x128xf32, #tpu.memory_space<vmem>>, vector<16x128xf32>,
    return
  }
  func.func @transform_0(%arg0: i32) -> (i32, i32) {
    %c0_i32 = arith.constant 0 : i32
    %c0_i32_0 = arith.constant 0 : i32
    return %arg0, %c0_i32 : i32, i32
  }
  func.func @transform_1(%arg0: i32) -> (i32, i32) {
    %c0_i32 = arith.constant 0 : i32
    %c0_i32_0 = arith.constant 0 : i32
    %c0_i32_1 = arith.constant 0 : i32
    return %c0_i32, %c0_i32_0 : i32, i32
  }
  func.func @transform_2(%arg0: i32) -> (i32, i32) {
    %c0_i32 = arith.constant 0 : i32
    %c0_i32_0 = arith.constant 0 : i32
    %c0_i32_1 = arith.constant 0 : i32
    return %c0_i32, %c0_i32_0 : i32, i32
  }
  func.func @transform_3(%arg0: i32) -> (i32, i32) {
    %c0_i32 = arith.constant 0 : i32
    %c0_i32_0 = arith.constant 0 : i32
    return %arg0, %c0_i32 : i32, i32
  }
}

</mosaic_0001>

<bundles_post_ra>
// kernel: tpu_custom_call.1
= control target key start
LH: loop header
LB: loop body
LE: loop exit
PB: predicated region body
PF: predicated region fallthrough
CT: control target
= control target key end

     0   :  { %8 = vsyncpa [#allocation3], 0  ;;  %s430_s0 = inlined_call_operand.hbm [shape: bf16[16,256], index: 0, kind: input, shape index: {}]   ;;  %s431_s1 = inlined_call_operand.hbm [shape: bf16[256,128], index: 1, kind: input, shape index: {}]   ;;  %s432_s2 = inlined_call_operand.vmem [shape: f32[1,128], index: 2, kind: input, shape index: {}]   ;;  %s433_s3 = inlined_call_operand.hbm [shape: f32[16,128], index: 3, kind: output, shape index: {}]  }
   0x1   :  { %9 = vsyncpa [#allocation6], 0 }
   0x2   :  { %10 = vsyncpa [#allocation4], 0  ;;  %s385_s12 = smov [#allocation2]  }
   0x3   :  { %s16_s13 = sshll.u32 %s385_s12, 4  ;;  %s17_s13 = int_to_ptr.vmem [resolvable:$true] %s16_s13 }
   0x4   :  { %s327_s14 = scalar_lea.vmem %s17_s13, 256  ;;  %p332_p1 = scmp.lt.s32.totalorder %s17_s13, %s17_s13 }
   0x5   :  { %p328_p0 = scmp.ne.s32.totalorder %s17_s13, %s327_s14  ;;  %p333_p2 = scmp.lt.s32.totalorder %s327_s14, %s327_s14 }
   0x7   :  { %p334_p3 = por %p333_p2, %p332_p1 }
   0x9   :  { %p335_p4 = pnand %p334_p3, %p328_p0 }
   0xb   :  { %338 = shalt.err (!%p335_p4)
}
   0xc   :  { %s386_s15 = smov 128   ;;  %s387_s16 = smov 8  }
   0xd   :  { %22 = dma.hbm_to_vmem [thread:$0]  %s430_s0, 256, %s17_s13, [#allocation3], %s386_s15, %s386_s15, %s387_s16  }
   0xe   :  { %s388_s19 = smov [#allocation5]  }
   0xf   :  { %s28_s20 = sshll.u32 %s388_s19, 4  ;;  %s29_s20 = int_to_ptr.vmem [resolvable:$true] %s28_s20 }
  0x10   :  { %s347_s21 = scalar_lea.vmem %s29_s20, 2048  ;;  %p352_p6 = scmp.lt.s32.totalorder %s29_s20, %s29_s20 }
  0x11   :  { %p348_p5 = scmp.ne.s32.totalorder %s29_s20, %s347_s21  ;;  %p353_p7 = scmp.lt.s32.totalorder %s347_s21, %s347_s21 }
  0x13   :  { %p354_p8 = por %p353_p7, %p352_p6 }
  0x15   :  { %p355_p9 = pnand %p354_p8, %p348_p5 }
  0x17   :  { %358 = shalt.err (!%p355_p9)
}
  0x18   :  { %s389_s22 = smov 64   ;;  %s390_s23 = smov 4  }
  0x19   :  { %34 = dma.hbm_to_vmem [thread:$0]  %s431_s1, 2048, %s29_s20, [#allocation6], %s389_s22, %s389_s22, %s390_s23  }
  0x1a   :  { %379 = dma.done.wait [#allocation3], 256  }
  0x1b   :  { %380 = vsyncadd [#allocation3], 4294967040 }
  0x1c   :  { %381 = dma.done.wait [#allocation6], 2048  }
  0x1d   :  { %382 = vsyncadd [#allocation6], 4294965248  ;;  %v300_v0 = vld [vmem:[#allocation5 + $0x78] sm:$0xff]   ;;  %v302_v2 = vld [vmem:[#allocation5 + $0x70] sm:$0xff]   ;;  %s391_s26 = smov [#allocation7]  }
  0x1e   :  { %v301_v1 = vld [vmem:[#allocation5 + $0x38] sm:$0xff]   ;;  %271 = vmatprep.subr.bf16.mxu0 %v300_v0  ;;  %v303_v3 = vld [vmem:[#allocation5 + $0x30] sm:$0xff]   ;;  %v304_v4 = vld [vmem:[#allocation5 + $0x68] sm:$0xff]   ;;  %s239_s27 = sshll.u32 %s391_s26, 4  ;;  %s240_s27 = int_to_ptr.vmem [resolvable:$true] %s239_s27 }
  0x1f   :  { %272 = vmatpush3.bf16.msra.mxu0 %v301_v1  ;;  %v305_v5 = vld [vmem:[#allocation5 + $0x28] sm:$0xff]   ;;  %v306_v6 = vld [vmem:[#allocation5 + $0x60] sm:$0xff]   ;;  %v308_v8 = vld [vmem:[#allocation5 + $0x58] sm:$0xff]   ;;  %s359_s28 = scalar_lea.vmem %s240_s27, 256  ;;  %p364_p11 = scmp.lt.s32.totalorder %s240_s27, %s240_s27 }
  0x20   :  { %273 = vmatprep.subr.bf16.mxu0 %v302_v2  ;;  %v307_v7 = vld [vmem:[#allocation5 + $0x20] sm:$0xff]   ;;  %v309_v9 = vld [vmem:[#allocation5 + $0x18] sm:$0xff]   ;;  %v310_v10 = vld [vmem:[#allocation5 + $0x50] sm:$0xff]   ;;  %p360_p10 = scmp.ne.s32.totalorder %s240_s27, %s359_s28  ;;  %p365_p12 = scmp.lt.s32.totalorder %s359_s28, %s359_s28 }
  0x21   :  { %v318_v11 = vld [vmem:[#allocation2 + $0x4] ss:$8 sps:$4 sm:$0xff]   ;;  %v312_v13 = vld [vmem:[#allocation5 + $0x48] sm:$0xff]   ;;  %v314_v15 = vld [vmem:[#allocation5 + $0x40] sm:$0xff]  }
  0x22   :  { %v311_v12 = vld [vmem:[#allocation5 + $0x10] sm:$0xff]   ;;  %223 = vmatprep.mubr.bf16.mxu0 %v318_v11  ;;  %v313_v14 = vld [vmem:[#allocation5 + $0x8] sm:$0xff]   ;;  %v315_v16 = vld [vmem:[#allocation5] sm:$0xff]   ;;  %p366_p13 = por %p365_p12, %p364_p11 }
  0x23   :  { %274 = vmatpush3.bf16.msra.mxu0 %v303_v3  ;;  %v316_v17 = vld [vmem:[#allocation2] ss:$8 sps:$4 sm:$0xff]  }
  0x24   :  { %275 = vmatprep.subr.bf16.mxu0 %v304_v4  ;;  %v252_v19 = vld [vmem:[%s432_s2] ss:$0 sm:$0xff]  ;;  %p367_p0 = pnand %p366_p13, %p360_p10 }
  0x27   :  { %276 = vmatpush3.bf16.msra.mxu0 %v305_v5 }
  0x28   :  { %277 = vmatprep.subr.bf16.mxu0 %v306_v6 }
  0x2b   :  { %278 = vmatpush3.bf16.msra.mxu0 %v307_v7 }
  0x2c   :  { %279 = vmatprep.subr.bf16.mxu0 %v308_v8 }
  0x2f   :  { %280 = vmatpush3.bf16.msra.mxu0 %v309_v9 }
  0x30   :  { %281 = vmatprep.subr.bf16.mxu0 %v310_v10 }
  0x33   :  { %282 = vmatpush3.bf16.msra.mxu0 %v311_v12 }
  0x34   :  { %283 = vmatprep.subr.bf16.mxu0 %v312_v13 }
  0x37   :  { %284 = vmatpush3.bf16.msra.mxu0 %v313_v14 }
  0x38   :  { %285 = vmatprep.subr.bf16.mxu0 %v314_v15 }
  0x3b   :  { %286 = vmatpush3.bf16.msra.mxu0 %v315_v16 }
  0x3e   :  { %224 = vmatmul.mubr.bf16.vlgmr.msra.gmra.mxu0 %v316_v17 }
  0xfe   :  { %v287_v18 = vpop.f32.mrf.mxu0 }
 0x100   :  { %v288_v20 = vpop.f32.mrf.mxu0 }
 0x101   :  { %v289_v21 = vadd.f32 %v288_v20, %v287_v18 }
 0x102   :  { %v290_v22 = vpop.f32.mrf.mxu0 }
 0x103   :  { %v226_v23 = vadd.f32 %v289_v21, %v252_v19 }
 0x104   :  { %v291_v24 = vpop.f32.mrf.mxu0 }
 0x105   :  { %232 = vst [vmem:[#allocation7] sm:$0xff] %v226_v23  ;;  %v292_v25 = vadd.f32 %v291_v24, %v290_v22 }
 0x107   :  { %v229_v26 = vadd.f32 %v292_v25, %v252_v19 }
 0x109   :  { %233 = vst [vmem:[#allocation7 + $0x8] sm:$0xff] %v229_v26 }
 0x10a   :  { %370 = shalt.err (!%p367_p0)
}
 0x10b   :  { %245 = dma.vmem_to_hbm [thread:$0]  %s240_s27, 256, %s433_s3, [#allocation4], %s386_s15, %s386_s15, %s387_s16  }
 0x10c   :  { %383 = dma.done.wait [#allocation4], 256  }
 0x10d   :  { %384 = vsyncadd [#allocation4], 4294967040 }
 0x10e   :  { %249 = vsyncpa [#allocation3], 1 }
 0x10f   :  { %250 = vsyncpa [#allocation6], 1 }
 0x110   :  { %251 = vsyncpa [#allocation4], 1 }

// kernel: tpu_custom_call.1
= control target key start
LH: loop header
LB: loop body
LE: loop exit
PB: predicated region body
PF: predicated region fallthrough
CT: control target
= control target key end

     0   :  { %8 = vsyncpa [#allocation3], 0  ;;  %s430_s0 = inlined_call_operand.hbm [shape: bf16[16,256], index: 0, kind: input, shape index: {}]   ;;  %s431_s1 = inlined_call_operand.hbm [shape: bf16[256,128], index: 1, kind: input, shape index: {}]   ;;  %s432_s2 = inlined_call_operand.vmem [shape: f32[1,128], index: 2, kind: input, shape index: {}]   ;;  %s433_s3 = inlined_call_operand.hbm [shape: f32[16,128], index: 3, kind: output, shape index: {}]  }
   0x1   :  { %9 = vsyncpa [#allocation6], 0 }
   0x2   :  { %10 = vsyncpa [#allocation4], 0  ;;  %s385_s12 = smov [#allocation2]  }
   0x3   :  { %s16_s13 = sshll.u32 %s385_s12, 4  ;;  %s17_s13 = int_to_ptr.vmem [resolvable:$true] %s16_s13 }
   0x4   :  { %s327_s14 = scalar_lea.vmem %s17_s13, 256  ;;  %p332_p1 = scmp.lt.s32.totalorder %s17_s13, %s17_s13 }
   0x5   :  { %p328_p0 = scmp.ne.s32.totalorder %s17_s13, %s327_s14  ;;  %p333_p2 = scmp.lt.s32.totalorder %s327_s14, %s327_s14 }
   0x7   :  { %p334_p3 = por %p333_p2, %p332_p1 }
   0x9   :  { %p335_p4 = pnand %p334_p3, %p328_p0 }
   0xb   :  { %338 = shalt.err (!%p335_p4)
}
   0xc   :  { %s386_s15 = smov 128   ;;  %s387_s16 = smov 8  }
   0xd   :  { %22 = dma.hbm_to_vmem [thread:$0]  %s430_s0, 256, %s17_s13, [#allocation3], %s386_s15, %s386_s15, %s387_s16  }
   0xe   :  { %s388_s19 = smov [#allocation5]  }
   0xf   :  { %s28_s20 = sshll.u32 %s388_s19, 4  ;;  %s29_s20 = int_to_ptr.vmem [resolvable:$true] %s28_s20 }
  0x10   :  { %s347_s21 = scalar_lea.vmem %s29_s20, 2048  ;;  %p352_p6 = scmp.lt.s32.totalorder %s29_s20, %s29_s20 }
  0x11   :  { %p348_p5 = scmp.ne.s32.totalorder %s29_s20, %s347_s21  ;;  %p353_p7 = scmp.lt.s32.totalorder %s347_s21, %s347_s21 }
  0x13   :  { %p354_p8 = por %p353_p7, %p352_p6 }
  0x15   :  { %p355_p9 = pnand %p354_p8, %p348_p5 }
  0x17   :  { %358 = shalt.err (!%p355_p9)
}
  0x18   :  { %s389_s22 = smov 64   ;;  %s390_s23 = smov 4  }
  0x19   :  { %34 = dma.hbm_to_vmem [thread:$0]  %s431_s1, 2048, %s29_s20, [#allocation6], %s389_s22, %s389_s22, %s390_s23  }
  0x1a   :  { %379 = dma.done.wait [#allocation3], 256  }
  0x1b   :  { %380 = vsyncadd [#allocation3], 4294967040 }
  0x1c   :  { %381 = dma.done.wait [#allocation6], 2048  }
  0x1d   :  { %382 = vsyncadd [#allocation6], 4294965248  ;;  %v300_v0 = vld [vmem:[#allocation5 + $0x78] sm:$0xff]   ;;  %v302_v2 = vld [vmem:[#allocation5 + $0x70] sm:$0xff]   ;;  %s391_s26 = smov [#allocation7]  }
  0x1e   :  { %v301_v1 = vld [vmem:[#allocation5 + $0x38] sm:$0xff]   ;;  %271 = vmatprep.subr.bf16.mxu0 %v300_v0  ;;  %v303_v3 = vld [vmem:[#allocation5 + $0x30] sm:$0xff]   ;;  %v304_v4 = vld [vmem:[#allocation5 + $0x68] sm:$0xff]   ;;  %s239_s27 = sshll.u32 %s391_s26, 4  ;;  %s240_s27 = int_to_ptr.vmem [resolvable:$true] %s239_s27 }
  0x1f   :  { %272 = vmatpush3.bf16.msra.mxu0 %v301_v1  ;;  %v305_v5 = vld [vmem:[#allocation5 + $0x28] sm:$0xff]   ;;  %v306_v6 = vld [vmem:[#allocation5 + $0x60] sm:$0xff]   ;;  %v308_v8 = vld [vmem:[#allocation5 + $0x58] sm:$0xff]   ;;  %s359_s28 = scalar_lea.vmem %s240_s27, 256  ;;  %p364_p11 = scmp.lt.s32.totalorder %s240_s27, %s240_s27 }
  0x20   :  { %273 = vmatprep.subr.bf16.mxu0 %v302_v2  ;;  %v307_v7 = vld [vmem:[#allocation5 + $0x20] sm:$0xff]   ;;  %v309_v9 = vld [vmem:[#allocation5 + $0x18] sm:$0xff]   ;;  %v310_v10 = vld [vmem:[#allocation5 + $0x50] sm:$0xff]   ;;  %p360_p10 = scmp.ne.s32.totalorder %s240_s27, %s359_s28  ;;  %p365_p12 = scmp.lt.s32.totalorder %s359_s28, %s359_s28 }
  0x21   :  { %v318_v11 = vld [vmem:[#allocation2 + $0x4] ss:$8 sps:$4 sm:$0xff]   ;;  %v312_v13 = vld [vmem:[#allocation5 + $0x48] sm:$0xff]   ;;  %v314_v15 = vld [vmem:[#allocation5 + $0x40] sm:$0xff]  }
  0x22   :  { %v311_v12 = vld [vmem:[#allocation5 + $0x10] sm:$0xff]   ;;  %223 = vmatprep.mubr.bf16.mxu0 %v318_v11  ;;  %v313_v14 = vld [vmem:[#allocation5 + $0x8] sm:$0xff]   ;;  %v315_v16 = vld [vmem:[#allocation5] sm:$0xff]   ;;  %p366_p13 = por %p365_p12, %p364_p11 }
  0x23   :  { %274 = vmatpush3.bf16.msra.mxu0 %v303_v3  ;;  %v316_v17 = vld [vmem:[#allocation2] ss:$8 sps:$4 sm:$0xff]  }
  0x24   :  { %275 = vmatprep.subr.bf16.mxu0 %v304_v4  ;;  %v252_v19 = vld [vmem:[%s432_s2] ss:$0 sm:$0xff]  ;;  %p367_p0 = pnand %p366_p13, %p360_p10 }
  0x27   :  { %276 = vmatpush3.bf16.msra.mxu0 %v305_v5 }
  0x28   :  { %277 = vmatprep.subr.bf16.mxu0 %v306_v6 }
  0x2b   :  { %278 = vmatpush3.bf16.msra.mxu0 %v307_v7 }
  0x2c   :  { %279 = vmatprep.subr.bf16.mxu0 %v308_v8 }
  0x2f   :  { %280 = vmatpush3.bf16.msra.mxu0 %v309_v9 }
  0x30   :  { %281 = vmatprep.subr.bf16.mxu0 %v310_v10 }
  0x33   :  { %282 = vmatpush3.bf16.msra.mxu0 %v311_v12 }
  0x34   :  { %283 = vmatprep.subr.bf16.mxu0 %v312_v13 }
  0x37   :  { %284 = vmatpush3.bf16.msra.mxu0 %v313_v14 }
  0x38   :  { %285 = vmatprep.subr.bf16.mxu0 %v314_v15 }
  0x3b   :  { %286 = vmatpush3.bf16.msra.mxu0 %v315_v16 }
  0x3e   :  { %224 = vmatmul.mubr.bf16.vlgmr.msra.gmra.mxu0 %v316_v17 }
  0xfe   :  { %v287_v18 = vpop.f32.mrf.mxu0 }
 0x100   :  { %v288_v20 = vpop.f32.mrf.mxu0 }
 0x101   :  { %v289_v21 = vadd.f32 %v288_v20, %v287_v18 }
 0x102   :  { %v290_v22 = vpop.f32.mrf.mxu0 }
 0x103   :  { %v226_v23 = vadd.f32 %v289_v21, %v252_v19 }
 0x104   :  { %v291_v24 = vpop.f32.mrf.mxu0 }
 0x105   :  { %232 = vst [vmem:[#allocation7] sm:$0xff] %v226_v23  ;;  %v292_v25 = vadd.f32 %v291_v24, %v290_v22 }
 0x107   :  { %v229_v26 = vadd.f32 %v292_v25, %v252_v19 }
 0x109   :  { %233 = vst [vmem:[#allocation7 + $0x8] sm:$0xff] %v229_v26 }
 0x10a   :  { %370 = shalt.err (!%p367_p0)
}
 0x10b   :  { %245 = dma.vmem_to_hbm [thread:$0]  %s240_s27, 256, %s433_s3, [#allocation4], %s386_s15, %s386_s15, %s387_s16  }
 0x10c   :  { %383 = dma.done.wait [#allocation4], 256  }
 0x10d   :  { %384 = vsyncadd [#allocation4], 4294967040 }
 0x10e   :  { %249 = vsyncpa [#allocation3], 1 }
 0x10f   :  { %250 = vsyncpa [#allocation6], 1 }
 0x110   :  { %251 = vsyncpa [#allocation4], 1 }

</bundles_post_ra>
